<compile_context>
chip_gen: v5e
topology: v5e:2x2
jax: 0.10.0
libtpu: 0.0.40
codegen_flags: <defaults>
</compile_context>

<pallas_src>
import functools

import jax
import jax.numpy as jnp
from jax.experimental import pallas as pl
from jax.experimental.pallas import tpu as pltpu


def _round_up(a, b):
    return (a + b - 1) // b * b


# ---------------------------------------------------------------------------
# Kernel A: lane-dense transposed GEMM
#   out(C_out, Mt) = act( W(C_out, K) @ P(K, Mt) + shift(C_out, 1) )
# ---------------------------------------------------------------------------
def _gemm_bias_act_kernel(p_ref, w_ref, b_ref, o_ref, *, relu):
    acc = jnp.dot(w_ref[...], p_ref[...], preferred_element_type=jnp.float32)
    y = acc + b_ref[...]
    if relu:
        y = jnp.maximum(y, 0.0)
    o_ref[...] = y.astype(o_ref.dtype)


def gemm_bias_act(w, p, b, *, relu, out_dtype, tm=1024):
    """w: (C_out, K) bf16 (BN scale folded), p: (K, M) bf16, b: (C_out, 1) f32."""
    C_o, K = w.shape
    Kp, M = p.shape
    assert K == Kp
    tm = min(tm, _round_up(M, 128))          # lane tile, multiple of 128
    Mp = _round_up(M, tm)                    # cdiv-style padding instead of assert
    if Mp != M:
        p = jnp.pad(p, ((0, 0), (0, Mp - M)))
    out = pl.pallas_call(
        functools.partial(_gemm_bias_act_kernel, relu=relu),
        out_shape=jax.ShapeDtypeStruct((C_o, Mp), out_dtype),
        grid=(Mp // tm,),
        in_specs=[
            pl.BlockSpec((K, tm), lambda i: (0, i)),      # patches tile (lanes = spatial)
            pl.BlockSpec((C_o, K), lambda i: (0, 0)),     # weights resident
            pl.BlockSpec((C_o, 1), lambda i: (0, 0)),     # per-channel shift resident
        ],
        out_specs=pl.BlockSpec((C_o, tm), lambda i: (0, i)),
        compiler_params=pltpu.CompilerParams(
            dimension_semantics=("parallel",),
            vmem_limit_bytes=64 * 1024 * 1024),
    )(p, w, b)
    return out[:, :M] if Mp != M else out


# ---------------------------------------------------------------------------
# Kernel B: fused  conv2(3x3, s1, p1) + BN2  +  shortcut(1x1 conv + BN)  + add + ReLU
# conv2 taps are formed in-kernel as shifted lane windows of the halo-padded y1 slab,
# masked at row/image borders.  Output (C_out, M) is lane-dense.
# ---------------------------------------------------------------------------
def _conv3x3_shortcut_kernel(y1p_ref, mask_ref, xs_ref, w2_ref, b2_ref,
                             wsc_ref, bsc_ref, o_ref, *, c_mid, w_out, halo):
    C_out, M = o_ref.shape
    mask = mask_ref[...]          # (9, M) bf16 {0,1}
    w2 = w2_ref[...]              # (C_out, 9*c_mid) bf16, BN scale folded
    acc = jnp.zeros((C_out, M), jnp.float32)
    for t in range(9):            # unrolled 3x3 taps
        dy, dx = divmod(t, 3)
        shift = (dy - 1) * w_out + (dx - 1)
        slab = y1p_ref[:, pl.ds(halo + shift, M)] * mask[t:t + 1, :]   # (c_mid, M) bf16
        acc = acc + jnp.dot(w2[:, t * c_mid:(t + 1) * c_mid], slab,
                            preferred_element_type=jnp.float32)
    res = jnp.dot(wsc_ref[...], xs_ref[...], preferred_element_type=jnp.float32)
    out = acc + b2_ref[...] + res + bsc_ref[...]
    o_ref[...] = jnp.maximum(out, 0.0).astype(o_ref.dtype)


# ---------------------------------------------------------------------------
# Plain-JAX glue: BN folding, transposed tap extraction, tap-validity masks
# ---------------------------------------------------------------------------
def bn_scale_shift(bn, eps=1e-5):
    gamma, beta, mean, var = bn
    scale = gamma / jnp.sqrt(var + eps)
    shift = beta - mean * scale
    return scale, shift


def _fold_w3x3(w_oihw, scale):
    """(C_out, C_in, 3, 3) -> (C_out, 9*C_in), columns ordered (dy, dx, c_in);
    BN scale folded into the output-channel rows (transposed GEMM)."""
    C_out, C_in, kH, kW = w_oihw.shape
    wt = jnp.transpose(w_oihw, (0, 2, 3, 1)).reshape(C_out, kH * kW * C_in)
    return (wt * scale[:, None]).astype(jnp.bfloat16)


def _conv_taps_T(xc, k, stride, pad, Ho, Wo):
    """xc: (C, N, H, W) -> transposed patches (k*k*C, N*Ho*Wo) in bf16 (tap-major rows)."""
    C, N, H, W = xc.shape
    xp = jnp.pad(xc, ((0, 0), (0, 0), (pad, pad), (pad, pad))).astype(jnp.bfloat16)
    taps = []
    for dy in range(k):
        for dx in range(k):
            taps.append(xp[:, :, dy:dy + stride * Ho:stride, dx:dx + stride * Wo:stride])
    p = jnp.stack(taps, axis=0)                       # (k*k, C, N, Ho, Wo)
    return p.reshape(k * k * C, N * Ho * Wo)


def _tap_masks(N, Ho, Wo):
    """(9, M) {0,1} masks marking in-bounds 3x3 taps (pad=1) for each flattened position."""
    m = jnp.arange(N * Ho * Wo)
    wo = m % Wo
    ho = (m // Wo) % Ho
    rows = []
    for dy in range(3):
        for dx in range(3):
            ok = ((ho + dy - 1 >= 0) & (ho + dy - 1 < Ho) &
                  (wo + dx - 1 >= 0) & (wo + dx - 1 < Wo))
            rows.append(ok)
    return jnp.stack(rows, axis=0).astype(jnp.bfloat16)


# ---------------------------------------------------------------------------
# BuildingBlock forward
# ---------------------------------------------------------------------------
def building_block_forward(x_nchw, params, *, down_sample=True):
    N, C_in, H, W = x_nchw.shape
    C_out = params["w1"].shape[0]
    stride = 2 if down_sample else 1
    Ho = (H + 2 - 3) // stride + 1
    Wo = (W + 2 - 3) // stride + 1
    M = N * Ho * Wo

    # Channels-on-sublanes layout: (C, N, H, W); flattened spatial goes to lanes.
    xc = jnp.transpose(x_nchw, (1, 0, 2, 3))

    # --- conv1 (3x3, pad 1, stride s) + BN1 + ReLU -----------------------------------
    s1, b1 = bn_scale_shift(params["bn1"])
    w1f = _fold_w3x3(params["w1"], s1)
    p1 = _conv_taps_T(xc, 3, stride, 1, Ho, Wo)
    y1 = gemm_bias_act(w1f, p1, b1.reshape(C_out, 1).astype(jnp.float32),
                       relu=True, out_dtype=jnp.bfloat16)          # (C_out, M) bf16

    # --- conv2 + BN2 + shortcut + residual add + ReLU (single fused kernel) ----------
    s2, b2 = bn_scale_shift(params["bn2"])
    w2f = _fold_w3x3(params["w2"], s2)
    b2c = b2.reshape(C_out, 1).astype(jnp.float32)

    if down_sample:
        ssc, bsc = bn_scale_shift(params["bn_sc"])
        wscf = (params["w_sc"].reshape(C_out, C_in) * ssc[:, None]).astype(jnp.bfloat16)
        bscc = bsc.reshape(C_out, 1).astype(jnp.float32)
        xs = xc[:, :, ::2, ::2].reshape(C_in, M).astype(jnp.bfloat16)   # 1x1 conv, stride 2
    else:
        if C_in != C_out:
            raise ValueError("identity shortcut requires C_in == C_out")
        wscf = jnp.eye(C_out, dtype=jnp.bfloat16)                       # identity shortcut
        bscc = jnp.zeros((C_out, 1), jnp.float32)
        xs = xc.reshape(C_in, M).astype(jnp.bfloat16)

    halo = Wo + 1                                   # max |lane shift| of a 3x3 tap
    y1p = jnp.pad(y1, ((0, 0), (halo, halo)))       # (C_out, M + 2*halo) bf16
    mask = _tap_masks(N, Ho, Wo)

    C_sc = xs.shape[0]
    out = pl.pallas_call(
        functools.partial(_conv3x3_shortcut_kernel, c_mid=C_out, w_out=Wo, halo=halo),
        out_shape=jax.ShapeDtypeStruct((C_out, M), jnp.float32),
        grid=(1,),  # TODO(synk): halo-aware M tiling for large feature maps
        in_specs=[
            pl.BlockSpec((C_out, M + 2 * halo), lambda i: (0, 0)),
            pl.BlockSpec((9, M), lambda i: (0, 0)),
            pl.BlockSpec((C_sc, M), lambda i: (0, 0)),
            pl.BlockSpec((C_out, 9 * C_out), lambda i: (0, 0)),
            pl.BlockSpec((C_out, 1), lambda i: (0, 0)),
            pl.BlockSpec((C_out, C_sc), lambda i: (0, 0)),
            pl.BlockSpec((C_out, 1), lambda i: (0, 0)),
        ],
        out_specs=pl.BlockSpec((C_out, M), lambda i: (0, 0)),
        compiler_params=pltpu.CompilerParams(
            dimension_semantics=("arbitrary",),
            vmem_limit_bytes=64 * 1024 * 1024),
    )(y1p, mask, xs, w2f, b2c, wscf, bscc)

    return jnp.transpose(out.reshape(C_out, N, Ho, Wo), (1, 0, 2, 3))   # back to NCHW


# ---------------------------------------------------------------------------
# Pure-JAX f32 reference (for correctness check, down_sample=True path)
# ---------------------------------------------------------------------------
def reference_forward(x, params, eps=1e-5):
    def conv(x, w, stride, pad):
        return jax.lax.conv_general_dilated(
            x, w, (stride, stride), [(pad, pad), (pad, pad)],
            dimension_numbers=("NCHW", "OIHW", "NCHW"))

    def bn(x, p):
        g, b, m, v = (a[None, :, None, None] for a in p)
        return (x - m) / jnp.sqrt(v + eps) * g + b

    y = jnp.maximum(bn(conv(x, params["w1"], 2, 1), params["bn1"]), 0.0)
    y = bn(conv(y, params["w2"], 1, 1), params["bn2"])
    s = bn(conv(x, params["w_sc"], 2, 0), params["bn_sc"])
    return jnp.maximum(y + s, 0.0)


# ---------------------------------------------------------------------------
if __name__ == "__main__":
    N, C_in, H, W = 2, 4, 16, 16
    C_out = 8

    key = jax.random.PRNGKey(0)
    ks = jax.random.split(key, 12)

    def bn_params(k0, k1, k2, k3, c):
        return (1.0 + 0.1 * jax.random.normal(k0, (c,), jnp.float32),   # gamma
                0.1 * jax.random.normal(k1, (c,), jnp.float32),         # beta
                0.1 * jax.random.normal(k2, (c,), jnp.float32),         # running_mean
                jax.random.uniform(k3, (c,), jnp.float32, 0.5, 1.5))    # running_var

    params = {
        "w1": 0.1 * jax.random.normal(ks[0], (C_out, C_in, 3, 3), jnp.float32),
        "w2": 0.1 * jax.random.normal(ks[1], (C_out, C_out, 3, 3), jnp.float32),
        "w_sc": 0.1 * jax.random.normal(ks[2], (C_out, C_in, 1, 1), jnp.float32),
        "bn1": bn_params(ks[3], ks[4], ks[5], ks[6], C_out),
        "bn2": bn_params(ks[7], ks[8], ks[9], ks[10], C_out),
    }
    k_sc = jax.random.split(ks[11], 4)
    params["bn_sc"] = bn_params(k_sc[0], k_sc[1], k_sc[2], k_sc[3], C_out)

    x = jax.random.normal(jax.random.PRNGKey(1), (N, C_in, H, W), jnp.float32)

    out = jax.jit(functools.partial(building_block_forward, down_sample=True))(x, params)
    out = jax.block_until_ready(out)

    ref = jax.block_until_ready(reference_forward(x, params))
    assert out.shape == (N, C_out, H // 2, W // 2), out.shape
    # bf16 MXU path vs f32 reference -> relaxed tolerance.
    err = float(jnp.max(jnp.abs(out - ref)))
    assert jnp.allclose(out, ref, atol=5e-2, rtol=5e-2), err

    print("KERNEL_OK")
</pallas_src>

<mosaic_0001>
module attributes {stable_mosaic.version = 11 : i64} {
  func.func @_gemm_bias_act_kernel(%arg0: i32, %arg1: memref<36x128xbf16, #tpu.memory_space<vmem>>, %arg2: memref<8x36xbf16, #tpu.memory_space<vmem>>, %arg3: memref<8x1xf32, #tpu.memory_space<vmem>>, %arg4: memref<8x128xbf16, #tpu.memory_space<vmem>>) attributes {dimension_semantics = [#tpu.dimension_semantics<parallel>], iteration_bounds = array<i64: 1>, scalar_prefetch = 0 : i64, scratch_operands = 0 : i64, tpu.core_type = #tpu.core_type<tc>, window_params = [{transform_indices = @transform_0, window_bounds = array<i64: 36, 128>}, {pipeline_mode = #tpu.pipeline_mode<synchronous>, transform_indices = @transform_1, window_bounds = array<i64: 8, 36>}, {pipeline_mode = #tpu.pipeline_mode<synchronous>, transform_indices = @transform_2, window_bounds = array<i64: 8, 1>}, {transform_indices = @transform_3, window_bounds = array<i64: 8, 128>}]} {
    %c0 = arith.constant 0 : index
    %c0_0 = arith.constant 0 : index
    %0 = vector.load %arg2[%c0, %c0_0] : memref<8x36xbf16, #tpu.memory_space<vmem>>, vector<8x36xbf16>
    %c0_1 = arith.constant 0 : index
    %c0_2 = arith.constant 0 : index
    %1 = vector.load %arg1[%c0_1, %c0_2] : memref<36x128xbf16, #tpu.memory_space<vmem>>, vector<36x128xbf16>
    %cst = arith.constant dense<0.000000e+00> : vector<8x128xf32>
    %2 = tpu.matmul %0, %1, %cst {dimension_numbers = #tpu.dot_dimension_numbers<[1], [0], [0], [1], [0, 0, 1, 1], [], []>} : vector<8x36xbf16>, vector<36x128xbf16>, vector<8x128xf32> -> vector<8x128xf32>
    %c0_3 = arith.constant 0 : index
    %c0_4 = arith.constant 0 : index
    %3 = vector.load %arg3[%c0_3, %c0_4] : memref<8x1xf32, #tpu.memory_space<vmem>>, vector<8x1xf32>
    %4 = vector.broadcast %3 : vector<8x1xf32> to vector<8x128xf32>
    %5 = arith.addf %2, %4 : vector<8x128xf32>
    %cst_5 = arith.constant 0.000000e+00 : f32
    %6 = vector.broadcast %cst_5 : f32 to vector<8x128xf32>
    %7 = arith.maximumf %5, %6 : vector<8x128xf32>
    %8 = arith.truncf %7 : vector<8x128xf32> to vector<8x128xbf16>
    %c0_6 = arith.constant 0 : index
    %c0_7 = arith.constant 0 : index
    %9 = vector.load %arg4[%c0_6, %c0_7] : memref<8x128xbf16, #tpu.memory_space<vmem>>, vector<8x128xbf16>
    tpu.vector_store %arg4[%c0_6, %c0_7], %8 {strides = array<i32>} : memref<8x128xbf16, #tpu.memory_space<vmem>>, vector<8x128xbf16>,
    return
  }
  func.func @transform_0(%arg0: i32) -> (i32, i32) {
    %c0_i32 = arith.constant 0 : i32
    %c0_i32_0 = arith.constant 0 : i32
    return %c0_i32, %arg0 : i32, i32
  }
  func.func @transform_1(%arg0: i32) -> (i32, i32) {
    %c0_i32 = arith.constant 0 : i32
    %c0_i32_0 = arith.constant 0 : i32
    %c0_i32_1 = arith.constant 0 : i32
    return %c0_i32, %c0_i32_0 : i32, i32
  }
  func.func @transform_2(%arg0: i32) -> (i32, i32) {
    %c0_i32 = arith.constant 0 : i32
    %c0_i32_0 = arith.constant 0 : i32
    %c0_i32_1 = arith.constant 0 : i32
    return %c0_i32, %c0_i32_0 : i32, i32
  }
  func.func @transform_3(%arg0: i32) -> (i32, i32) {
    %c0_i32 = arith.constant 0 : i32
    %c0_i32_0 = arith.constant 0 : i32
    return %c0_i32, %arg0 : i32, i32
  }
}

module attributes {stable_mosaic.version = 11 : i64} {
  func.func @_conv3x3_shortcut_kernel(%arg0: i32, %arg1: memref<8x146xbf16, #tpu.memory_space<vmem>>, %arg2: memref<9x128xbf16, #tpu.memory_space<vmem>>, %arg3: memref<4x128xbf16, #tpu.memory_space<vmem>>, %arg4: memref<8x72xbf16, #tpu.memory_space<vmem>>, %arg5: memref<8x1xf32, #tpu.memory_space<vmem>>, %arg6: memref<8x4xbf16, #tpu.memory_space<vmem>>, %arg7: memref<8x1xf32, #tpu.memory_space<vmem>>, %arg8: memref<8x128xf32, #tpu.memory_space<vmem>>) attributes {dimension_semantics = [#tpu.dimension_semantics<arbitrary>], iteration_bounds = array<i64: 1>, scalar_prefetch = 0 : i64, scratch_operands = 0 : i64, tpu.core_type = #tpu.core_type<tc>, window_params = [{pipeline_mode = #tpu.pipeline_mode<synchronous>, transform_indices = @transform_0, window_bounds = array<i64: 8, 146>}, {pipeline_mode = #tpu.pipeline_mode<synchronous>, transform_indices = @transform_1, window_bounds = array<i64: 9, 128>}, {pipeline_mode = #tpu.pipeline_mode<synchronous>, transform_indices = @transform_2, window_bounds = array<i64: 4, 128>}, {pipeline_mode = #tpu.pipeline_mode<synchronous>, transform_indices = @transform_3, window_bounds = array<i64: 8, 72>}, {pipeline_mode = #tpu.pipeline_mode<synchronous>, transform_indices = @transform_4, window_bounds = array<i64: 8, 1>}, {pipeline_mode = #tpu.pipeline_mode<synchronous>, transform_indices = @transform_5, window_bounds = array<i64: 8, 4>}, {pipeline_mode = #tpu.pipeline_mode<synchronous>, transform_indices = @transform_6, window_bounds = array<i64: 8, 1>}, {pipeline_mode = #tpu.pipeline_mode<synchronous>, transform_indices = @transform_7, window_bounds = array<i64: 8, 128>}]} {
    %c0 = arith.constant 0 : index
    %c0_0 = arith.constant 0 : index
    %0 = vector.load %arg2[%c0, %c0_0] : memref<9x128xbf16, #tpu.memory_space<vmem>>, vector<9x128xbf16>
    %c0_1 = arith.constant 0 : index
    %c0_2 = arith.constant 0 : index
    %1 = vector.load %arg4[%c0_1, %c0_2] : memref<8x72xbf16, #tpu.memory_space<vmem>>, vector<8x72xbf16>
    %cst = arith.constant 0.000000e+00 : f32
    %2 = vector.broadcast %cst : f32 to vector<8x128xf32>
    %c0_3 = arith.constant 0 : index
    %c0_4 = arith.constant 0 : index
    %3 = vector.load %arg1[%c0_3, %c0_4] : memref<8x146xbf16, #tpu.memory_space<vmem>>, vector<8x128xbf16>
    %4 = vector.extract_strided_slice %0 {offsets = [0, 0], sizes = [1, 128], strides = [1, 1]} : vector<9x128xbf16> to vector<1x128xbf16>
    %5 = vector.broadcast %4 : vector<1x128xbf16> to vector<8x128xbf16>
    %6 = arith.mulf %3, %5 : vector<8x128xbf16>
    %7 = vector.extract_strided_slice %1 {offsets = [0, 0], sizes = [8, 8], strides = [1, 1]} : vector<8x72xbf16> to vector<8x8xbf16>
    %cst_5 = arith.constant dense<0.000000e+00> : vector<8x128xf32>
    %8 = tpu.matmul %7, %6, %cst_5 {dimension_numbers = #tpu.dot_dimension_numbers<[1], [0], [0], [1], [0, 0, 1, 1], [], []>} : vector<8x8xbf16>, vector<8x128xbf16>, vector<8x128xf32> -> vector<8x128xf32>
    %9 = arith.addf %2, %8 : vector<8x128xf32>
    %c0_6 = arith.constant 0 : index
    %c1 = arith.constant 1 : index
    %10 = vector.load %arg1[%c0_6, %c1] : memref<8x146xbf16, #tpu.memory_space<vmem>>, vector<8x128xbf16>
    %11 = vector.extract_strided_slice %0 {offsets = [1, 0], sizes = [1, 128], strides = [1, 1]} : vector<9x128xbf16> to vector<1x128xbf16>
    %12 = vector.broadcast %11 : vector<1x128xbf16> to vector<8x128xbf16>
    %13 = arith.mulf %10, %12 : vector<8x128xbf16>
    %14 = vector.extract_strided_slice %1 {offsets = [0, 8], sizes = [8, 8], strides = [1, 1]} : vector<8x72xbf16> to vector<8x8xbf16>
    %cst_7 = arith.constant dense<0.000000e+00> : vector<8x128xf32>
    %15 = tpu.matmul %14, %13, %cst_7 {dimension_numbers = #tpu.dot_dimension_numbers<[1], [0], [0], [1], [0, 0, 1, 1], [], []>} : vector<8x8xbf16>, vector<8x128xbf16>, vector<8x128xf32> -> vector<8x128xf32>
    %16 = arith.addf %9, %15 : vector<8x128xf32>
    %c0_8 = arith.constant 0 : index
    %c2 = arith.constant 2 : index
    %17 = vector.load %arg1[%c0_8, %c2] : memref<8x146xbf16, #tpu.memory_space<vmem>>, vector<8x128xbf16>
    %18 = vector.extract_strided_slice %0 {offsets = [2, 0], sizes = [1, 128], strides = [1, 1]} : vector<9x128xbf16> to vector<1x128xbf16>
    %19 = vector.broadcast %18 : vector<1x128xbf16> to vector<8x128xbf16>
    %20 = arith.mulf %17, %19 : vector<8x128xbf16>
    %21 = vector.extract_strided_slice %1 {offsets = [0, 16], sizes = [8, 8], strides = [1, 1]} : vector<8x72xbf16> to vector<8x8xbf16>
    %cst_9 = arith.constant dense<0.000000e+00> : vector<8x128xf32>
    %22 = tpu.matmul %21, %20, %cst_9 {dimension_numbers = #tpu.dot_dimension_numbers<[1], [0], [0], [1], [0, 0, 1, 1], [], []>} : vector<8x8xbf16>, vector<8x128xbf16>, vector<8x128xf32> -> vector<8x128xf32>
    %23 = arith.addf %16, %22 : vector<8x128xf32>
    %c0_10 = arith.constant 0 : index
    %c8 = arith.constant 8 : index
    %24 = vector.load %arg1[%c0_10, %c8] : memref<8x146xbf16, #tpu.memory_space<vmem>>, vector<8x128xbf16>
    %25 = vector.extract_strided_slice %0 {offsets = [3, 0], sizes = [1, 128], strides = [1, 1]} : vector<9x128xbf16> to vector<1x128xbf16>
    %26 = vector.broadcast %25 : vector<1x128xbf16> to vector<8x128xbf16>
    %27 = arith.mulf %24, %26 : vector<8x128xbf16>
    %28 = vector.extract_strided_slice %1 {offsets = [0, 24], sizes = [8, 8], strides = [1, 1]} : vector<8x72xbf16> to vector<8x8xbf16>
    %cst_11 = arith.constant dense<0.000000e+00> : vector<8x128xf32>
    %29 = tpu.matmul %28, %27, %cst_11 {dimension_numbers = #tpu.dot_dimension_numbers<[1], [0], [0], [1], [0, 0, 1, 1], [], []>} : vector<8x8xbf16>, vector<8x128xbf16>, vector<8x128xf32> -> vector<8x128xf32>
    %30 = arith.addf %23, %29 : vector<8x128xf32>
    %c0_12 = arith.constant 0 : index
    %c9 = arith.constant 9 : index
    %31 = vector.load %arg1[%c0_12, %c9] : memref<8x146xbf16, #tpu.memory_space<vmem>>, vector<8x128xbf16>
    %32 = vector.extract_strided_slice %0 {offsets = [4, 0], sizes = [1, 128], strides = [1, 1]} : vector<9x128xbf16> to vector<1x128xbf16>
    %33 = vector.broadcast %32 : vector<1x128xbf16> to vector<8x128xbf16>
    %34 = arith.mulf %31, %33 : vector<8x128xbf16>
    %35 = vector.extract_strided_slice %1 {offsets = [0, 32], sizes = [8, 8], strides = [1, 1]} : vector<8x72xbf16> to vector<8x8xbf16>
    %cst_13 = arith.constant dense<0.000000e+00> : vector<8x128xf32>
    %36 = tpu.matmul %35, %34, %cst_13 {dimension_numbers = #tpu.dot_dimension_numbers<[1], [0], [0], [1], [0, 0, 1, 1], [], []>} : vector<8x8xbf16>, vector<8x128xbf16>, vector<8x128xf32> -> vector<8x128xf32>
    %37 = arith.addf %30, %36 : vector<8x128xf32>
    %c0_14 = arith.constant 0 : index
    %c10 = arith.constant 10 : index
    %38 = vector.load %arg1[%c0_14, %c10] : memref<8x146xbf16, #tpu.memory_space<vmem>>, vector<8x128xbf16>
    %39 = vector.extract_strided_slice %0 {offsets = [5, 0], sizes = [1, 128], strides = [1, 1]} : vector<9x128xbf16> to vector<1x128xbf16>
    %40 = vector.broadcast %39 : vector<1x128xbf16> to vector<8x128xbf16>
    %41 = arith.mulf %38, %40 : vector<8x128xbf16>
    %42 = vector.extract_strided_slice %1 {offsets = [0, 40], sizes = [8, 8], strides = [1, 1]} : vector<8x72xbf16> to vector<8x8xbf16>
    %cst_15 = arith.constant dense<0.000000e+00> : vector<8x128xf32>
    %43 = tpu.matmul %42, %41, %cst_15 {dimension_numbers = #tpu.dot_dimension_numbers<[1], [0], [0], [1], [0, 0, 1, 1], [], []>} : vector<8x8xbf16>, vector<8x128xbf16>, vector<8x128xf32> -> vector<8x128xf32>
    %44 = arith.addf %37, %43 : vector<8x128xf32>
    %c0_16 = arith.constant 0 : index
    %c16 = arith.constant 16 : index
    %45 = vector.load %arg1[%c0_16, %c16] : memref<8x146xbf16, #tpu.memory_space<vmem>>, vector<8x128xbf16>
    %46 = vector.extract_strided_slice %0 {offsets = [6, 0], sizes = [1, 128], strides = [1, 1]} : vector<9x128xbf16> to vector<1x128xbf16>
    %47 = vector.broadcast %46 : vector<1x128xbf16> to vector<8x128xbf16>
    %48 = arith.mulf %45, %47 : vector<8x128xbf16>
    %49 = vector.extract_strided_slice %1 {offsets = [0, 48], sizes = [8, 8], strides = [1, 1]} : vector<8x72xbf16> to vector<8x8xbf16>
    %cst_17 = arith.constant dense<0.000000e+00> : vector<8x128xf32>
    %50 = tpu.matmul %49, %48, %cst_17 {dimension_numbers = #tpu.dot_dimension_numbers<[1], [0], [0], [1], [0, 0, 1, 1], [], []>} : vector<8x8xbf16>, vector<8x128xbf16>, vector<8x128xf32> -> vector<8x128xf32>
    %51 = arith.addf %44, %50 : vector<8x128xf32>
    %c0_18 = arith.constant 0 : index
    %c17 = arith.constant 17 : index
    %52 = vector.load %arg1[%c0_18, %c17] : memref<8x146xbf16, #tpu.memory_space<vmem>>, vector<8x128xbf16>
    %53 = vector.extract_strided_slice %0 {offsets = [7, 0], sizes = [1, 128], strides = [1, 1]} : vector<9x128xbf16> to vector<1x128xbf16>
    %54 = vector.broadcast %53 : vector<1x128xbf16> to vector<8x128xbf16>
    %55 = arith.mulf %52, %54 : vector<8x128xbf16>
    %56 = vector.extract_strided_slice %1 {offsets = [0, 56], sizes = [8, 8], strides = [1, 1]} : vector<8x72xbf16> to vector<8x8xbf16>
    %cst_19 = arith.constant dense<0.000000e+00> : vector<8x128xf32>
    %57 = tpu.matmul %56, %55, %cst_19 {dimension_numbers = #tpu.dot_dimension_numbers<[1], [0], [0], [1], [0, 0, 1, 1], [], []>} : vector<8x8xbf16>, vector<8x128xbf16>, vector<8x128xf32> -> vector<8x128xf32>
    %58 = arith.addf %51, %57 : vector<8x128xf32>
    %c0_20 = arith.constant 0 : index
    %c18 = arith.constant 18 : index
    %59 = vector.load %arg1[%c0_20, %c18] : memref<8x146xbf16, #tpu.memory_space<vmem>>, vector<8x128xbf16>
    %60 = vector.extract_strided_slice %0 {offsets = [8, 0], sizes = [1, 128], strides = [1, 1]} : vector<9x128xbf16> to vector<1x128xbf16>
    %61 = vector.broadcast %60 : vector<1x128xbf16> to vector<8x128xbf16>
    %62 = arith.mulf %59, %61 : vector<8x128xbf16>
    %63 = vector.extract_strided_slice %1 {offsets = [0, 64], sizes = [8, 8], strides = [1, 1]} : vector<8x72xbf16> to vector<8x8xbf16>
    %cst_21 = arith.constant dense<0.000000e+00> : vector<8x128xf32>
    %64 = tpu.matmul %63, %62, %cst_21 {dimension_numbers = #tpu.dot_dimension_numbers<[1], [0], [0], [1], [0, 0, 1, 1], [], []>} : vector<8x8xbf16>, vector<8x128xbf16>, vector<8x128xf32> -> vector<8x128xf32>
    %65 = arith.addf %58, %64 : vector<8x128xf32>
    %c0_22 = arith.constant 0 : index
    %c0_23 = arith.constant 0 : index
    %66 = vector.load %arg6[%c0_22, %c0_23] : memref<8x4xbf16, #tpu.memory_space<vmem>>, vector<8x4xbf16>
    %c0_24 = arith.constant 0 : index
    %c0_25 = arith.constant 0 : index
    %67 = vector.load %arg3[%c0_24, %c0_25] : memref<4x128xbf16, #tpu.memory_space<vmem>>, vector<4x128xbf16>
    %cst_26 = arith.constant dense<0.000000e+00> : vector<8x128xf32>
    %68 = tpu.matmul %66, %67, %cst_26 {dimension_numbers = #tpu.dot_dimension_numbers<[1], [0], [0], [1], [0, 0, 1, 1], [], []>} : vector<8x4xbf16>, vector<4x128xbf16>, vector<8x128xf32> -> vector<8x128xf32>
    %c0_27 = arith.constant 0 : index
    %c0_28 = arith.constant 0 : index
    %69 = vector.load %arg5[%c0_27, %c0_28] : memref<8x1xf32, #tpu.memory_space<vmem>>, vector<8x1xf32>
    %70 = vector.broadcast %69 : vector<8x1xf32> to vector<8x128xf32>
    %71 = arith.addf %65, %70 : vector<8x128xf32>
    %72 = arith.addf %71, %68 : vector<8x128xf32>
    %c0_29 = arith.constant 0 : index
    %c0_30 = arith.constant 0 : index
    %73 = vector.load %arg7[%c0_29, %c0_30] : memref<8x1xf32, #tpu.memory_space<vmem>>, vector<8x1xf32>
    %74 = vector.broadcast %73 : vector<8x1xf32> to vector<8x128xf32>
    %75 = arith.addf %72, %74 : vector<8x128xf32>
    %cst_31 = arith.constant 0.000000e+00 : f32
    %76 = vector.broadcast %cst_31 : f32 to vector<8x128xf32>
    %77 = arith.maximumf %75, %76 : vector<8x128xf32>
    %c0_32 = arith.constant 0 : index
    %c0_33 = arith.constant 0 : index
    %78 = vector.load %arg8[%c0_32, %c0_33] : memref<8x128xf32, #tpu.memory_space<vmem>>, vector<8x128xf32>
    tpu.vector_store %arg8[%c0_32, %c0_33], %77 {strides = array<i32>} : memref<8x128xf32, #tpu.memory_space<vmem>>, vector<8x128xf32>,
    return
  }
  func.func @transform_0(%arg0: i32) -> (i32, i32) {
    %c0_i32 = arith.constant 0 : i32
    %c0_i32_0 = arith.constant 0 : i32
    %c0_i32_1 = arith.constant 0 : i32
    return %c0_i32, %c0_i32_0 : i32, i32
  }
  func.func @transform_1(%arg0: i32) -> (i32, i32) {
    %c0_i32 = arith.constant 0 : i32
    %c0_i32_0 = arith.constant 0 : i32
    %c0_i32_1 = arith.constant 0 : i32
    return %c0_i32, %c0_i32_0 : i32, i32
  }
  func.func @transform_2(%arg0: i32) -> (i32, i32) {
    %c0_i32 = arith.constant 0 : i32
    %c0_i32_0 = arith.constant 0 : i32
    %c0_i32_1 = arith.constant 0 : i32
    return %c0_i32, %c0_i32_0 : i32, i32
  }
  func.func @transform_3(%arg0: i32) -> (i32, i32) {
    %c0_i32 = arith.constant 0 : i32
    %c0_i32_0 = arith.constant 0 : i32
    %c0_i32_1 = arith.constant 0 : i32
    return %c0_i32, %c0_i32_0 : i32, i32
  }
  func.func @transform_4(%arg0: i32) -> (i32, i32) {
    %c0_i32 = arith.constant 0 : i32
    %c0_i32_0 = arith.constant 0 : i32
    %c0_i32_1 = arith.constant 0 : i32
    return %c0_i32, %c0_i32_0 : i32, i32
  }
  func.func @transform_5(%arg0: i32) -> (i32, i32) {
    %c0_i32 = arith.constant 0 : i32
    %c0_i32_0 = arith.constant 0 : i32
    %c0_i32_1 = arith.constant 0 : i32
    return %c0_i32, %c0_i32_0 : i32, i32
  }
  func.func @transform_6(%arg0: i32) -> (i32, i32) {
    %c0_i32 = arith.constant 0 : i32
    %c0_i32_0 = arith.constant 0 : i32
    %c0_i32_1 = arith.constant 0 : i32
    return %c0_i32, %c0_i32_0 : i32, i32
  }
  func.func @transform_7(%arg0: i32) -> (i32, i32) {
    %c0_i32 = arith.constant 0 : i32
    %c0_i32_0 = arith.constant 0 : i32
    %c0_i32_1 = arith.constant 0 : i32
    return %c0_i32, %c0_i32_0 : i32, i32
  }
}

</mosaic_0001>

<bundles_post_ra>
// kernel: building_block_forward.2
= control target key start
LH: loop header
LB: loop body
LE: loop exit
PB: predicated region body
PF: predicated region fallthrough
CT: control target
= control target key end

     0   :  { %v83_v1 = vmov 0   ;;  %vm46_vm0 = vcmask 1041408   ;;  %vm42_vm1 = vcmask 293888   ;;  %s122_s0 = inlined_call_operand.vmem [shape: bf16[36,128], index: 0, kind: input, shape index: {}]   ;;  %s123_s2 = inlined_call_operand.vmem [shape: f32[8,1], index: 2, kind: input, shape index: {}]   ;;  %s124_s1 = inlined_call_operand.vmem [shape: bf16[8,36], index: 1, kind: input, shape index: {}]   ;;  %s125_s3 = inlined_call_operand.vmem [shape: bf16[8,128], index: 3, kind: output, shape index: {}]  }
   0x1   :  { %v20_v0 = vld [vmem:[%s122_s0 + $0x10] sm:$0x3]  ;;  %82 = vset.pattern.permute.xlu0 %v83_v1  ;;  %v21_v3 = vld [vmem:[%s123_s2] sm:$0xff]  ;;  %v80_v6 = vld [vmem:[%s122_s0 + $0x8] sm:$0xff] }
   0x2   :  { %v36_v2 = vunpack.c.l.b16 %v20_v0  ;;  %24 = vperm.xlu0 %82, %v21_v3   ;;  %v79_v7 = vld [vmem:[%s122_s0] sm:$0xff] }
   0x3   :  { %v15_v8 = vld [vmem:[%s124_s1] sm:$0xf] }
   0x4   :  { %v39_v4 = vpack.c.b16 %v36_v2, %v36_v2 }
   0x6   :  { %v48_v5 = vsel %vm46_vm0, %v39_v4, 0 }
   0x7   :  { %55 = vmatpush.bf16.msra.mxu0 %v48_v5 }
   0xb   :  { %56 = vmatpush.bf16.msra.mxu0 %v80_v6 }
   0xf   :  { %57 = vmatpush.bf16.msra.mxu0 %v79_v7 }
  0x12   :  { %78 = vmatmul.msk.bf16.vlgmr.msra.gmra.mxu0 %vm42_vm1, %v15_v8 }
  0x74   :  { %v25_v9 = vpop.permute.xlu0 %24 }
  0x8f   :  { %v59_v10 = vpop.f32.mrf.mxu0 }
  0x90   :  { %v60_v11 = vadd.f32 %v59_v10, %v25_v9 }
  0x92   :  { %v63_v12 = vmax.f32 %v60_v11, 0.0 }
  0x94   :  { %v64_v13 = vpack.c.bf16 %v63_v12, %v63_v12 }
  0x96   :  { %65 = vst [vmem:[%s125_s3] sm:$0xf] %v64_v13 }
  0x97   :  { %v61_v14 = vpop.f32.mrf.mxu0 }

// kernel: building_block_forward.3
= control target key start
LH: loop header
LB: loop body
LE: loop exit
PB: predicated region body
PF: predicated region fallthrough
CT: control target
= control target key end

     0   :  { %s470_s26 = smov 9   ;;  %s471_s27 = smov 16   ;;  %vm72_vm0 = vcmask 1043456   ;;  %vm68_vm1 = vcmask 64512   ;;  %vm126_vm2 = vcmask 1031168   ;;  %vm286_vm3 = vcmask 916480   ;;  %s621_s1 = inlined_call_operand.vmem [shape: bf16[9,128], index: 1, kind: input, shape index: {}]   ;;  %s622_s3 = inlined_call_operand.vmem [shape: bf16[8,72], index: 3, kind: input, shape index: {}]   ;;  %s623_s0 = inlined_call_operand.vmem [shape: bf16[8,146], index: 0, kind: input, shape index: {}]   ;;  %s624_s2 = inlined_call_operand.vmem [shape: bf16[4,128], index: 2, kind: input, shape index: {}]   ;;  %s625_s6 = inlined_call_operand.vmem [shape: f32[8,1], index: 6, kind: input, shape index: {}]   ;;  %s626_s4 = inlined_call_operand.vmem [shape: f32[8,1], index: 4, kind: input, shape index: {}]   ;;  %s627_s5 = inlined_call_operand.vmem [shape: bf16[8,4], index: 5, kind: input, shape index: {}]   ;;  %s628_s7 = inlined_call_operand.vmem [shape: f32[8,128], index: 7, kind: output, shape index: {}]  }
   0x1   :  { %v27_v0 = vld [vmem:[%s621_s1] sm:$0xf]  ;;  %v28_v12 = vld [vmem:[%s621_s1 + $0x4] sm:$0x1]  ;;  %s472_s30 = smov 1   ;;  %s473_s8 = smov 8  }
   0x2   :  { %v40_v1 = vshrl.u32 %v27_v0, 16  ;;  %v536_v2 = vpack.i.b16 %v27_v0, %v27_v0  ;;  %v349_v15 = vpack.i.b16 %v28_v12, %v28_v12  ;;  %s474_s9 = smov 10   ;;  %s475_s10 = smov 2   ;;  %v547_v21 = vld [vmem:[%s622_s3] sm:$0xf]  ;;  %vm166_vm4 = vcmask 982016  }
   0x3   :  { %s476_s1 = smov 18   ;;  %v56_v23 = vunpack.c.l.b16 %v547_v21  ;;  %s477_s13 = smov 17   ;;  %v39_v25 = vld [vmem:[%s623_s0] sm:$0xff]  ;;  %vm206_vm5 = vcmask 973824   ;;  %vm66_vm6 = vcmask 1039360   ;;  %vm246_vm7 = vcmask 965632  }
   0x4   :  { %v41_v3 = vpack.i.b16 %v40_v1, %v40_v1  ;;  %v188_v4 = vperm.slane %v536_v2, 2  ;;  %v268_v5 = vperm.slane %v536_v2, 3  ;;  %v108_v13 = vperm.slane %v536_v2, 1  ;;  %s478_s14 = smov 120   ;;  %s479_s15 = smov 112  }
   0x5   :  { %v351_v18 = vperm.slane %v349_v15, 0  ;;  %v550_v24 = vpack.c.b16 %v56_v23, %v56_v23  ;;  %s480_s16 = smov 104   ;;  %v560_v26 = vunpack.c.l.bf16 %v39_v25  ;;  %v45_v33 = vunpack.c.h.bf16 %v39_v25  ;;  %s481_s18 = smov 126  }
   0x6   :  { %v43_v6 = vperm.slane %v41_v3, 0  ;;  %v189_v7 = vunpack.c.l.bf16 %v188_v4  ;;  %v269_v8 = vunpack.c.l.bf16 %v268_v5  ;;  %v148_v10 = vperm.slane %v41_v3, 1  ;;  %s482_s19 = smov 118   ;;  %s483_s20 = smov 119  }
   0x7   :  { %v228_v11 = vperm.slane %v41_v3, 2  ;;  %v109_v17 = vunpack.c.l.bf16 %v108_v13  ;;  %v308_v19 = vperm.slane %v41_v3, 3  ;;  %v352_v20 = vunpack.c.l.bf16 %v351_v18  ;;  %s484_s21 = smov 111   ;;  %s485_s22 = smov 127  }
   0x8   :  { %v46_v9 = vunpack.c.l.bf16 %v43_v6  ;;  %191 = vrot.lane.b32.xlu1 %v189_v7, %s470_s26  ;;  %271 = vrot.lane.b32.xlu2 %v269_v8, %s471_s27  ;;  %v149_v14 = vunpack.c.l.bf16 %v148_v10  ;;  %s486_s23 = smov 72   ;;  %s487_s24 = smov 96   ;;  %v34_v6 = vperm.slane %v536_v2, 0  ;;  %v30_v7 = vld [vmem:[%s623_s0] sm:$0xf]  ;;  %vm397_vm8 = vcmask 1041408  }
   0x9   :  { %v229_v16 = vunpack.c.l.bf16 %v228_v11  ;;  %v309_v22 = vunpack.c.l.bf16 %v308_v19  ;;  %s488_s25 = smov 64   ;;  %s489_s26 = smov 88   ;;  %v35_v8 = vunpack.c.l.bf16 %v30_v7  ;;  %vm326_vm9 = vcmask 908288  }
   0xa   :  { %48 = vrot.lane.b32.xlu0 %v46_v9, %s472_s30  ;;  %s490_s27 = smov 80   ;;  %s491_s28 = smov 110   ;;  %v36_v9 = vunpack.c.l.bf16 %v34_v6  ;;  %vm369_vm10 = vcmask 900096   ;;  %vm393_vm11 = vcmask 31744  }
   0xc   :  { %v37_v11 = vmul.f32 %v36_v9, %v35_v8 }
   0xe   :  { %v38_v13 = vpack.c.bf16 %v37_v11, %v37_v11 }
  0x10   :  { %151 = vrot.lane.b32.xlu1 %v149_v14, %s473_s8  ;;  %231 = vrot.lane.b32.xlu2 %v229_v16, %s474_s9  ;;  %v93_v14 = vsel %vm72_vm0, %v38_v13, 0 }
  0x11   :  { %102 = vmatpush.bf16.msra.mxu1 %v93_v14 }
  0x12   :  { %111 = vrot.lane.b32.xlu0 %v109_v17, %s475_s10 }
  0x14   :  { %436 = vmatmul.msk.bf16.vlgmr.msra.gmra.mxu1 %vm68_vm1, %v547_v21 }
  0x18   :  { %354 = vrot.lane.b32.xlu1 %v352_v20, %s476_s1 }
  0x1a   :  { %311 = vrot.lane.b32.xlu0 %v309_v22, %s477_s13 }
  0x20   :  { %58 = vrot.lane.b32.xlu1 %v550_v24, %s478_s14 }
  0x22   :  { %118 = vrot.lane.b32.xlu0 %v550_v24, %s479_s15 }
  0x28   :  { %158 = vrot.lane.b32.xlu1 %v550_v24, %s480_s16 }
  0x62   :  { %v272_v27 = vpop.permute.xlu2 %271 }
  0x63   :  { %v274_v28 = vmul.f32 %v272_v27, %v560_v26  ;;  %v275_v55 = vmul.f32 %v272_v27, %v45_v33 }
  0x65   :  { %v276_v29 = vpack.c.bf16 %v274_v28, %v274_v28  ;;  %v277_v56 = vpack.c.bf16 %v275_v55, %v275_v55 }
  0x67   :  { %282 = vrot.lane.b32.xlu1 %v276_v29, %s479_s15 }
  0x6a   :  { %v232_v36 = vpop.permute.xlu2 %231 }
  0x6b   :  { %v234_v42 = vmul.f32 %v232_v36, %v560_v26  ;;  %v235_v59 = vmul.f32 %v232_v36, %v45_v33 }
  0x6d   :  { %v236_v45 = vpack.c.bf16 %v234_v42, %v234_v42  ;;  %v237_v61 = vpack.c.bf16 %v235_v59, %v235_v59  ;;  %v414_v42 = vld [vmem:[%s626_s4] sm:$0xff] }
  0x7a   :  { %v192_v30 = vpop.permute.xlu1 %191 }
  0x7b   :  { %v194_v43 = vmul.f32 %v192_v30, %v560_v26  ;;  %v195_v44 = vmul.f32 %v192_v30, %v45_v33  ;;  %v392_v30 = vld [vmem:[%s624_s2] sm:$0x3] }
  0x7c   :  { %v49_v31 = vpop.permute.xlu0 %48  ;;  %v399_v36 = vsel %vm397_vm8, %v392_v30, 0 }
  0x7d   :  { %v196_v47 = vpack.c.bf16 %v194_v43, %v194_v43  ;;  %v197_v48 = vpack.c.bf16 %v195_v44, %v195_v44  ;;  %v51_v50 = vmul.f32 %v49_v31, %v560_v26  ;;  %v52_v51 = vmul.f32 %v49_v31, %v45_v33 }
  0x7e   :  { %v492_v43 = vmov 0  }
  0x7f   :  { %v53_v53 = vpack.c.bf16 %v51_v50, %v51_v50  ;;  %v54_v54 = vpack.c.bf16 %v52_v51, %v52_v51  ;;  %469 = vset.pattern.permute.xlu0 %v492_v43  ;;  %468 = vset.pattern.permute.xlu2 %v492_v43  ;;  %v391_v51 = vld [vmem:[%s627_s5] sm:$0xf] }
  0x82   :  { %v152_v32 = vpop.permute.xlu1 %151 }
  0x83   :  { %v154_v34 = vmul.f32 %v152_v32, %v560_v26  ;;  %v155_v57 = vmul.f32 %v152_v32, %v45_v33 }
  0x84   :  { %v112_v35 = vpop.permute.xlu0 %111 }
  0x85   :  { %v114_v37 = vmul.f32 %v112_v35, %v560_v26  ;;  %v115_v38 = vmul.f32 %v112_v35, %v45_v33  ;;  %v156_v39 = vpack.c.bf16 %v154_v34, %v154_v34  ;;  %v157_v58 = vpack.c.bf16 %v155_v57, %v155_v57 }
  0x87   :  { %v116_v40 = vpack.c.bf16 %v114_v37, %v114_v37  ;;  %v117_v41 = vpack.c.bf16 %v115_v38, %v115_v38  ;;  %162 = vrot.lane.b32.xlu1 %v156_v39, %s478_s14 }
  0x89   :  { %124 = vrot.lane.b32.xlu0 %v117_v41, %s481_s18  ;;  %122 = vrot.lane.b32.xlu2 %v116_v40, %s481_s18  ;;  %v422_v41 = vld [vmem:[%s625_s6] sm:$0xff] }
  0x8a   :  { %v355_v60 = vpop.permute.xlu1 %354 }
  0x8b   :  { %v358_v62 = vmul.f32 %v355_v60, %v45_v33  ;;  %v357_v3 = vmul.f32 %v355_v60, %v560_v26 }
  0x8c   :  { %v312_v46 = vpop.permute.xlu0 %311 }
  0x8d   :  { %v314_v49 = vmul.f32 %v312_v46, %v560_v26  ;;  %v315_v63 = vmul.f32 %v312_v46, %v45_v33  ;;  %v360_v0 = vpack.c.bf16 %v358_v62, %v358_v62  ;;  %v359_v4 = vpack.c.bf16 %v357_v3, %v357_v3 }
  0x8f   :  { %242 = vrot.lane.b32.xlu1 %v236_v45, %s482_s19  ;;  %v316_v52 = vpack.c.bf16 %v314_v49, %v314_v49  ;;  %v317_v1 = vpack.c.bf16 %v315_v63, %v315_v63 }
  0x91   :  { %204 = vrot.lane.b32.xlu0 %v197_v48, %s483_s20  ;;  %202 = vrot.lane.b32.xlu2 %v196_v47, %s483_s20  ;;  %v104_v57 = vpop.f32.mrf.mxu1 }
  0x92   :  { %v59_v5 = vpop.permute.xlu1 %58 }
  0x94   :  { %v119_v16 = vpop.permute.xlu0 %118 }
  0x97   :  { %322 = vrot.lane.b32.xlu1 %v316_v52, %s484_s21 }
  0x99   :  { %64 = vrot.lane.b32.xlu0 %v54_v54, %s485_s22  ;;  %62 = vrot.lane.b32.xlu2 %v53_v53, %s485_s22 }
  0x9a   :  { %v159_v12 = vpop.permute.xlu1 %158 }
  0x9f   :  { %318 = vrot.lane.b32.xlu1 %v550_v24, %s486_s23 }
  0xa1   :  { %198 = vrot.lane.b32.xlu0 %v550_v24, %s487_s24  ;;  %284 = vrot.lane.b32.xlu2 %v277_v56, %s479_s15 }
  0xa7   :  { %361 = vrot.lane.b32.xlu1 %v550_v24, %s488_s25 }
  0xa9   :  { %238 = vrot.lane.b32.xlu0 %v550_v24, %s489_s26  ;;  %164 = vrot.lane.b32.xlu2 %v157_v58, %s478_s14  ;;  %v106_v58 = vpop.f32.mrf.mxu1 }
  0xb1   :  { %278 = vrot.lane.b32.xlu0 %v550_v24, %s490_s27  ;;  %244 = vrot.lane.b32.xlu2 %v237_v61, %s482_s19 }
  0xb9   :  { %367 = vrot.lane.b32.xlu0 %v360_v0, %s491_s28  ;;  %324 = vrot.lane.b32.xlu2 %v317_v1, %s484_s21 }
  0xc1   :  { %365 = vrot.lane.b32.xlu2 %v359_v4, %s491_s28  ;;  %425 = vperm.xlu0 %469, %v422_v41  }
  0xc9   :  { %417 = vperm.xlu2 %468, %v414_v42  }
  0xd9   :  { %v283_v2 = vpop.permute.xlu1 %282 }
  0xe3   :  { %v123_v10 = vpop.permute.xlu2 %122 }
  0xeb   :  { %v203_v15 = vpop.permute.xlu2 %202 }
  0xf3   :  { %v63_v17 = vpop.permute.xlu2 %62 }
  0xf9   :  { %v163_v18 = vpop.permute.xlu1 %162 }
  0xfb   :  { %v125_v19 = vpop.permute.xlu0 %124  ;;  %v285_v20 = vpop.permute.xlu2 %284 }
  0xfc   :  { %v127_v22 = vsel %vm126_vm2, %v123_v10, %v125_v19  ;;  %v287_v23 = vsel %vm286_vm3, %v283_v2, %v285_v20 }
  0xfd   :  { %v132_v24 = vsel %vm72_vm0, %v127_v22, 0  ;;  %v292_v25 = vsel %vm72_vm0, %v287_v23, 0 }
  0xfe   :  { %141 = vmatpush.bf16.msra.mxu2 %v132_v24 }
 0x101   :  { %437 = vmatmul.msk.bf16.vlgmr.msra.gmra.mxu2 %vm68_vm1, %v119_v16  ;;  %v243_v28 = vpop.permute.xlu1 %242 }
 0x102   :  { %301 = vmatpush.bf16.msrb.mxu2 %v292_v25 }
 0x103   :  { %v205_v21 = vpop.permute.xlu0 %204  ;;  %v165_v26 = vpop.permute.xlu2 %164 }
 0x104   :  { %v167_v27 = vsel %vm166_vm4, %v163_v18, %v165_v26  ;;  %v207_v33 = vsel %vm206_vm5, %v203_v15, %v205_v21 }
 0x105   :  { %v172_v29 = vsel %vm72_vm0, %v167_v27, 0  ;;  %v212_v39 = vsel %vm72_vm0, %v207_v33, 0 }
 0x106   :  { %181 = vmatpush.bf16.msra.mxu3 %v172_v29 }
 0x109   :  { %438 = vmatmul.msk.bf16.vlgmr.msra.gmra.mxu3 %vm68_vm1, %v159_v12  ;;  %v323_v40 = vpop.permute.xlu1 %322 }
 0x10b   :  { %v65_v31 = vpop.permute.xlu0 %64  ;;  %v245_v32 = vpop.permute.xlu2 %244 }
 0x10c   :  { %v67_v34 = vsel %vm66_vm6, %v63_v17, %v65_v31  ;;  %v247_v35 = vsel %vm246_vm7, %v243_v28, %v245_v32 }
 0x10d   :  { %v74_v37 = vsel %vm72_vm0, %v67_v34, 0  ;;  %v252_v38 = vsel %vm72_vm0, %v247_v35, 0 }
 0x10e   :  { %83 = vmatpush.bf16.msra.mxu0 %v74_v37  ;;  %261 = vmatpush.bf16.msrb.mxu1 %v252_v38 }
 0x111   :  { %435 = vmatmul.msk.bf16.vlgmr.msra.gmra.mxu0 %vm68_vm1, %v59_v5  ;;  %v319_v48 = vpop.permute.xlu1 %318 }
 0x112   :  { %221 = vmatpush.bf16.msrb.mxu0 %v212_v39  ;;  %408 = vmatpush.bf16.msra.mxu1 %v399_v36 }
 0x113   :  { %v199_v44 = vpop.permute.xlu0 %198  ;;  %v325_v45 = vpop.permute.xlu2 %324 }
 0x114   :  { %v327_v46 = vsel %vm326_vm9, %v323_v40, %v325_v45 }
 0x115   :  { %v332_v47 = vsel %vm72_vm0, %v327_v46, 0 }
 0x116   :  { %341 = vmatpush.bf16.msrb.mxu3 %v332_v47 }
 0x119   :  { %442 = vmatmul.msk.bf16.vlgmr.msrb.gmra.mxu3 %vm68_vm1, %v319_v48  ;;  %v362_v56 = vpop.permute.xlu1 %361 }
 0x11b   :  { %v239_v49 = vpop.permute.xlu0 %238  ;;  %v366_v52 = vpop.permute.xlu2 %365 }
 0x11c   :  { %440 = vmatmul.msk.bf16.vlgmr.msrb.gmra.mxu1 %vm68_vm1, %v239_v49 }
 0x121   :  { %439 = vmatmul.msk.bf16.vlgmr.msrb.gmra.mxu0 %vm68_vm1, %v199_v44 }
 0x123   :  { %v279_v50 = vpop.permute.xlu0 %278  ;;  %v418_v17 = vpop.permute.xlu2 %417 }
 0x124   :  { %441 = vmatmul.msk.bf16.vlgmr.msrb.gmra.mxu2 %vm68_vm1, %v279_v50 }
 0x12b   :  { %v368_v53 = vpop.permute.xlu0 %367 }
 0x12c   :  { %v370_v54 = vsel %vm369_vm10, %v366_v52, %v368_v53  ;;  %444 = vmatmul.msk.bf16.vlgmr.msra.gmra.mxu1 %vm393_vm11, %v391_v51 }
 0x12d   :  { %v375_v55 = vsel %vm72_vm0, %v370_v54, 0 }
 0x12e   :  { %384 = vmatpush.bf16.msra.mxu0 %v375_v55 }
 0x131   :  { %443 = vmatmul.msk.bf16.vlgmr.msra.gmra.mxu0 %vm68_vm1, %v362_v56 }
 0x133   :  { %v426_v23 = vpop.permute.xlu0 %425 }
 0x184   :  { %v143_v59 = vpop.f32.mrf.mxu2 }
 0x18c   :  { %v145_v60 = vpop.f32.mrf.mxu2  ;;  %v183_v61 = vpop.f32.mrf.mxu3 }
 0x18e   :  { %v85_v62 = vpop.f32.mrf.mxu0 }
 0x18f   :  { %v105_v1 = vadd.f32 %v104_v57, %v85_v62 }
 0x191   :  { %v147_v5 = vadd.f32 %v143_v59, %v105_v1 }
 0x193   :  { %v187_v7 = vadd.f32 %v183_v61, %v147_v5 }
 0x194   :  { %v185_v63 = vpop.f32.mrf.mxu3 }
 0x196   :  { %v87_v0 = vpop.f32.mrf.mxu0 }
 0x199   :  { %v263_v3 = vpop.f32.mrf.mxu1 }
 0x19c   :  { %v343_v4 = vpop.f32.mrf.mxu3 }
 0x19e   :  { %v223_v6 = vpop.f32.mrf.mxu0 }
 0x19f   :  { %v227_v9 = vadd.f32 %v223_v6, %v187_v7 }
 0x1a1   :  { %v265_v8 = vpop.f32.mrf.mxu1  ;;  %v267_v12 = vadd.f32 %v263_v3, %v227_v9 }
 0x1a4   :  { %v345_v10 = vpop.f32.mrf.mxu3 }
 0x1a6   :  { %v225_v11 = vpop.f32.mrf.mxu0 }
 0x1a7   :  { %v303_v13 = vpop.f32.mrf.mxu2 }
 0x1a8   :  { %v307_v14 = vadd.f32 %v303_v13, %v267_v12 }
 0x1a9   :  { %v410_v15 = vpop.f32.mrf.mxu1 }
 0x1aa   :  { %v347_v2 = vadd.f32 %v343_v4, %v307_v14 }
 0x1ae   :  { %v386_v16 = vpop.f32.mrf.mxu0 }
 0x1af   :  { %v390_v18 = vadd.f32 %v386_v16, %v347_v2  ;;  %v305_v19 = vpop.f32.mrf.mxu2 }
 0x1b1   :  { %v420_v20 = vadd.f32 %v418_v17, %v390_v18  ;;  %v412_v22 = vpop.f32.mrf.mxu1 }
 0x1b3   :  { %v421_v24 = vadd.f32 %v420_v20, %v410_v15 }
 0x1b5   :  { %v428_v25 = vadd.f32 %v426_v23, %v421_v24 }
 0x1b6   :  { %v388_v21 = vpop.f32.mrf.mxu0 }
 0x1b7   :  { %v429_v26 = vmax.f32 %v428_v25, 0.0 }
 0x1b9   :  { %430 = vst [vmem:[%s628_s7] sm:$0xff] %v429_v26 }

</bundles_post_ra>
